<compile_context>
chip_gen: v5e
topology: v5e:2x2
jax: 0.10.0
libtpu: 0.0.40
codegen_flags: <defaults>
</compile_context>

<pallas_src>
import functools
import math

import jax
import jax.numpy as jnp
from jax import lax
from jax.experimental import pallas as pl
from jax.experimental.pallas import tpu as pltpu


# ---------------------------------------------------------------------------
# Phase 1: fused lane-dense projections (bf16 MXU operands, f32 accumulation).
# ---------------------------------------------------------------------------

def _q_proj_kernel(x_ref, w_ref, b_ref, o_ref, *, scale):
    """(1, tq, E) x (E, H*dk) -> (1, tq, H*dk) bf16, with 1/sqrt(dk) folded in."""
    y = jnp.dot(x_ref[0], w_ref[...], preferred_element_type=jnp.float32) + b_ref[...]
    o_ref[0] = (y * jnp.float32(scale)).astype(o_ref.dtype)


def _kv_proj_kernel(x_ref, wk_ref, bk_ref, wv_ref, bv_ref, k_ref, v_ref):
    """x_kv is read once; K and V projections share the loaded block."""
    x = x_ref[0]
    k_ref[0] = (jnp.dot(x, wk_ref[...], preferred_element_type=jnp.float32)
                + bk_ref[...]).astype(k_ref.dtype)
    v_ref[0] = (jnp.dot(x, wv_ref[...], preferred_element_type=jnp.float32)
                + bv_ref[...]).astype(v_ref.dtype)


# ---------------------------------------------------------------------------
# Phase 2: flash-style multi-head attention (online softmax over k tiles).
# ---------------------------------------------------------------------------

def _flash_mha_kernel(q_ref, k_ref, v_ref, mask_ref, o_ref,
                      m_scr, l_scr, acc_scr, *, head, dk, dv):
    """One (batch, q-tile, k-tile) grid point, all heads fused.

    q_ref   : (1, tq, H*dk) bf16 (already scaled by 1/sqrt(dk))
    k_ref   : (1, tk, H*dk) bf16        v_ref : (1, tk, H*dv) bf16
    mask_ref: (1, tq, tk)   int8 (nonzero == masked out)
    o_ref   : (1, tq, H*dv)
    m_scr/l_scr : (tq, H) f32 running max / denom (persist across k tiles)
    acc_scr     : (tq, H*dv) f32 running numerator
    """
    ki = pl.program_id(2)

    @pl.when(ki == 0)
    def _():
        m_scr[...] = jnp.full(m_scr.shape, -jnp.inf, jnp.float32)
        l_scr[...] = jnp.zeros(l_scr.shape, jnp.float32)
        acc_scr[...] = jnp.zeros(acc_scr.shape, jnp.float32)

    # Additive mask bias: decoded once per grid point, shared by all heads.
    bias = jnp.where(mask_ref[0] != 0, jnp.float32(-1e9), jnp.float32(0.0))

    for h in range(head):                       # static unroll over heads
        q_h = q_ref[0, :, h * dk:(h + 1) * dk]  # (tq, dk) bf16, sliced from ref
        k_h = k_ref[0, :, h * dk:(h + 1) * dk]  # (tk, dk) bf16
        v_h = v_ref[0, :, h * dv:(h + 1) * dv]  # (tk, dv) bf16

        # QK^T contracting the last dims directly (no materialized k.T).
        s = lax.dot_general(q_h, k_h, (((1,), (1,)), ((), ())),
                            preferred_element_type=jnp.float32) + bias  # (tq, tk)

        m_prev = m_scr[:, h:h + 1]                                      # (tq, 1)
        l_prev = l_scr[:, h:h + 1]
        m_new = jnp.maximum(m_prev, jnp.max(s, axis=-1, keepdims=True))
        alpha = jnp.exp(m_prev - m_new)
        p = jnp.exp(s - m_new)                                          # (tq, tk)

        # Commit this head's partial results immediately (bounded live ranges).
        l_scr[:, h:h + 1] = alpha * l_prev + jnp.sum(p, axis=-1, keepdims=True)
        acc_scr[:, h * dv:(h + 1) * dv] = (
            alpha * acc_scr[:, h * dv:(h + 1) * dv]
            + jnp.dot(p.astype(jnp.bfloat16), v_h,
                      preferred_element_type=jnp.float32))
        m_scr[:, h:h + 1] = m_new

    @pl.when(ki == pl.num_programs(2) - 1)
    def _():
        # EUP approx reciprocal instead of a VALU divide; per-head normalize,
        # lane-dense (tq, H*dv) output region written as we go.
        inv_l = pl.reciprocal(l_scr[...], approx=True)                  # (tq, H)
        for h in range(head):
            o_ref[0, :, h * dv:(h + 1) * dv] = (
                acc_scr[:, h * dv:(h + 1) * dv] * inv_l[:, h:h + 1]
            ).astype(o_ref.dtype)


# ---------------------------------------------------------------------------
# Wrapper
# ---------------------------------------------------------------------------

def _padded_bytes(rows, cols, itemsize):
    return ((rows + 7) // 8 * 8) * ((cols + 127) // 128 * 128) * itemsize


def multi_head_attention(x_q, x_kv, attn_mask, params, *, head, q_k_size, v_size,
                         out_dtype=jnp.float32):
    """x_q: (B, Sq, E), x_kv: (B, Sk, E), attn_mask: (B, Sq, Sk) bool.

    Returns (B, Sq, head * v_size), matching the PyTorch forward
    (z.transpose(1, 2).reshape(B, Sq, -1)).  Pass out_dtype=jnp.bfloat16 if the
    downstream consumer (W_o) accepts bf16 to halve the writeback traffic.
    """
    B, Sq, E = x_q.shape
    Sk = x_kv.shape[1]
    dqk = head * q_k_size
    dvv = head * v_size

    # Query / key tile sizes: whole sequence for short inputs, else fixed tiles.
    tq = Sq if Sq <= 256 else 256
    tk = Sk if Sk <= 512 else 512
    assert Sq % tq == 0, "Sq must be divisible by the query tile size"
    assert Sk % tk == 0, "Sk must be divisible by the key tile size"
    n_q, n_k = Sq // tq, Sk // tk

    # bf16 MXU operands; biases / accumulation stay f32.
    xq_b = x_q.astype(jnp.bfloat16)
    xkv_b = x_kv.astype(jnp.bfloat16)
    wq = params["w_q"].astype(jnp.bfloat16)
    wk = params["w_k"].astype(jnp.bfloat16)
    wv = params["w_v"].astype(jnp.bfloat16)
    bq = params["b_q"].reshape(1, dqk).astype(jnp.float32)
    bk = params["b_k"].reshape(1, dqk).astype(jnp.float32)
    bv = params["b_v"].reshape(1, dvv).astype(jnp.float32)
    mask_i8 = attn_mask.astype(jnp.int8)

    # --- Phase 1a: Q projection (scale folded in) ---------------------------
    q_proj = pl.pallas_call(
        functools.partial(_q_proj_kernel, scale=1.0 / math.sqrt(q_k_size)),
        out_shape=jax.ShapeDtypeStruct((B, Sq, dqk), jnp.bfloat16),
        grid=(B, n_q),
        in_specs=[
            pl.BlockSpec((1, tq, E), lambda b, i: (b, i, 0)),   # x_q
            pl.BlockSpec((E, dqk), lambda b, i: (0, 0)),        # w_q
            pl.BlockSpec((1, dqk), lambda b, i: (0, 0)),        # b_q
        ],
        out_specs=pl.BlockSpec((1, tq, dqk), lambda b, i: (b, i, 0)),
        compiler_params=pltpu.CompilerParams(
            dimension_semantics=("parallel", "parallel")),
    )(xq_b, wq, bq)

    # --- Phase 1b: K / V projections (x_kv read once per tile) --------------
    k_proj, v_proj = pl.pallas_call(
        _kv_proj_kernel,
        out_shape=(jax.ShapeDtypeStruct((B, Sk, dqk), jnp.bfloat16),
                   jax.ShapeDtypeStruct((B, Sk, dvv), jnp.bfloat16)),
        grid=(B, n_k),
        in_specs=[
            pl.BlockSpec((1, tk, E), lambda b, i: (b, i, 0)),   # x_kv
            pl.BlockSpec((E, dqk), lambda b, i: (0, 0)),        # w_k
            pl.BlockSpec((1, dqk), lambda b, i: (0, 0)),        # b_k
            pl.BlockSpec((E, dvv), lambda b, i: (0, 0)),        # w_v
            pl.BlockSpec((1, dvv), lambda b, i: (0, 0)),        # b_v
        ],
        out_specs=[
            pl.BlockSpec((1, tk, dqk), lambda b, i: (b, i, 0)),
            pl.BlockSpec((1, tk, dvv), lambda b, i: (b, i, 0)),
        ],
        compiler_params=pltpu.CompilerParams(
            dimension_semantics=("parallel", "parallel")),
    )(xkv_b, wk, bk, wv, bv)

    # --- Phase 2: flash-style attention --------------------------------------
    out_itemsize = jnp.dtype(out_dtype).itemsize
    block_bytes = (2 * _padded_bytes(tq, dqk, 2)         # q (double-buffered)
                   + 2 * _padded_bytes(tk, dqk, 2)       # k
                   + 2 * _padded_bytes(tk, dvv, 2)       # v
                   + 2 * _padded_bytes(tq, tk, 1)        # mask
                   + 2 * _padded_bytes(tq, dvv, out_itemsize))  # out
    scratch_bytes = (2 * _padded_bytes(tq, head, 4)      # m, l
                     + _padded_bytes(tq, dvv, 4))        # acc
    vmem_limit = int(min(96 * 2**20,
                         max(32 * 2**20, 2 * (block_bytes + scratch_bytes))))

    out = pl.pallas_call(
        functools.partial(_flash_mha_kernel, head=head, dk=q_k_size, dv=v_size),
        out_shape=jax.ShapeDtypeStruct((B, Sq, dvv), out_dtype),
        grid=(B, n_q, n_k),
        in_specs=[
            pl.BlockSpec((1, tq, dqk), lambda b, qi, ki: (b, qi, 0)),   # Q
            pl.BlockSpec((1, tk, dqk), lambda b, qi, ki: (b, ki, 0)),   # K
            pl.BlockSpec((1, tk, dvv), lambda b, qi, ki: (b, ki, 0)),   # V
            pl.BlockSpec((1, tq, tk), lambda b, qi, ki: (b, qi, ki)),   # mask
        ],
        out_specs=pl.BlockSpec((1, tq, dvv), lambda b, qi, ki: (b, qi, 0)),
        scratch_shapes=[
            pltpu.VMEM((tq, head), jnp.float32),   # running max per head
            pltpu.VMEM((tq, head), jnp.float32),   # running denom per head
            pltpu.VMEM((tq, dvv), jnp.float32),    # running numerator, all heads
        ],
        compiler_params=pltpu.CompilerParams(
            dimension_semantics=("parallel", "parallel", "arbitrary"),
            vmem_limit_bytes=vmem_limit),
    )(q_proj, k_proj, v_proj, mask_i8)

    return out


# ---------------------------------------------------------------------------
# Pure-JAX reference (matches the PyTorch forward without KV-cache)
# ---------------------------------------------------------------------------

def _reference(x_q, x_kv, attn_mask, params, *, head, q_k_size, v_size):
    B, Sq, E = x_q.shape
    Sk = x_kv.shape[1]
    q = x_q @ params["w_q"] + params["b_q"]
    k = x_kv @ params["w_k"] + params["b_k"]
    v = x_kv @ params["w_v"] + params["b_v"]
    q = q.reshape(B, Sq, head, q_k_size).transpose(0, 2, 1, 3)
    k = k.reshape(B, Sk, head, q_k_size).transpose(0, 2, 1, 3)
    v = v.reshape(B, Sk, head, v_size).transpose(0, 2, 1, 3)
    attn = jnp.einsum("bhqd,bhkd->bhqk", q, k) / math.sqrt(q_k_size)
    mask = attn_mask[:, None, :, :]
    attn = jnp.where(mask, jnp.float32(-1e9), attn)
    attn = jax.nn.softmax(attn, axis=-1)
    z = jnp.einsum("bhqk,bhkd->bhqd", attn, v)
    return z.transpose(0, 2, 1, 3).reshape(B, Sq, head * v_size)


if __name__ == "__main__":
    # Small, forward-consistent shapes.
    B, Sq, Sk = 2, 8, 8
    emb_size, q_k_size, v_size, head = 32, 16, 16, 4

    key = jax.random.PRNGKey(0)
    keys = jax.random.split(key, 9)

    scale = 1.0 / math.sqrt(emb_size)
    params = {
        "w_q": jax.random.normal(keys[0], (emb_size, head * q_k_size), jnp.float32) * scale,
        "b_q": jax.random.normal(keys[1], (head * q_k_size,), jnp.float32) * 0.01,
        "w_k": jax.random.normal(keys[2], (emb_size, head * q_k_size), jnp.float32) * scale,
        "b_k": jax.random.normal(keys[3], (head * q_k_size,), jnp.float32) * 0.01,
        "w_v": jax.random.normal(keys[4], (emb_size, head * v_size), jnp.float32) * scale,
        "b_v": jax.random.normal(keys[5], (head * v_size,), jnp.float32) * 0.01,
    }

    x_q = jax.random.normal(keys[6], (B, Sq, emb_size), jnp.float32)
    x_kv = jax.random.normal(keys[7], (B, Sk, emb_size), jnp.float32)
    # boolean mask: True => masked out (e.g. causal mask)
    attn_mask = jnp.triu(jnp.ones((Sq, Sk), dtype=bool), k=1)[None].repeat(B, axis=0)

    z = multi_head_attention(x_q, x_kv, attn_mask, params,
                             head=head, q_k_size=q_k_size, v_size=v_size)
    z = jax.block_until_ready(z)

    z_ref = _reference(x_q, x_kv, attn_mask, params,
                       head=head, q_k_size=q_k_size, v_size=v_size)
    assert z.shape == (B, Sq, head * v_size)
    # bf16 MXU operands + approx reciprocal vs. pure-f32 reference.
    assert jnp.allclose(z, z_ref, atol=2e-2, rtol=2e-2), (
        float(jnp.max(jnp.abs(z - z_ref))))

    print("KERNEL_OK")
</pallas_src>

<mosaic_0001>
module attributes {stable_mosaic.version = 11 : i64} {
  func.func @_q_proj_kernel(%arg0: i32, %arg1: i32, %arg2: memref<1x8x32xbf16, #tpu.memory_space<vmem>>, %arg3: memref<32x64xbf16, #tpu.memory_space<vmem>>, %arg4: memref<1x64xf32, #tpu.memory_space<vmem>>, %arg5: memref<1x8x64xbf16, #tpu.memory_space<vmem>>) attributes {dimension_semantics = [#tpu.dimension_semantics<parallel>, #tpu.dimension_semantics<parallel>], iteration_bounds = array<i64: 2, 1>, scalar_prefetch = 0 : i64, scratch_operands = 0 : i64, tpu.core_type = #tpu.core_type<tc>, window_params = [{transform_indices = @transform_0, window_bounds = array<i64: 1, 8, 32>}, {pipeline_mode = #tpu.pipeline_mode<synchronous>, transform_indices = @transform_1, window_bounds = array<i64: 32, 64>}, {pipeline_mode = #tpu.pipeline_mode<synchronous>, transform_indices = @transform_2, window_bounds = array<i64: 1, 64>}, {transform_indices = @transform_3, window_bounds = array<i64: 1, 8, 64>}]} {
    %c0 = arith.constant 0 : index
    %c0_0 = arith.constant 0 : index
    %c0_1 = arith.constant 0 : index
    %0 = vector.load %arg2[%c0, %c0_0, %c0_1] : memref<1x8x32xbf16, #tpu.memory_space<vmem>>, vector<1x8x32xbf16>
    %1 = vector.shape_cast %0 : vector<1x8x32xbf16> to vector<8x32xbf16>
    %c0_2 = arith.constant 0 : index
    %c0_3 = arith.constant 0 : index
    %2 = vector.load %arg3[%c0_2, %c0_3] : memref<32x64xbf16, #tpu.memory_space<vmem>>, vector<32x64xbf16>
    %cst = arith.constant dense<0.000000e+00> : vector<8x64xf32>
    %3 = tpu.matmul %1, %2, %cst {dimension_numbers = #tpu.dot_dimension_numbers<[1], [0], [0], [1], [0, 0, 1, 1], [], []>} : vector<8x32xbf16>, vector<32x64xbf16>, vector<8x64xf32> -> vector<8x64xf32>
    %c0_4 = arith.constant 0 : index
    %c0_5 = arith.constant 0 : index
    %4 = vector.load %arg4[%c0_4, %c0_5] : memref<1x64xf32, #tpu.memory_space<vmem>>, vector<1x64xf32>
    %5 = vector.broadcast %4 : vector<1x64xf32> to vector<8x64xf32>
    %6 = arith.addf %3, %5 : vector<8x64xf32>
    %cst_6 = arith.constant 2.500000e-01 : f32
    %7 = vector.broadcast %cst_6 : f32 to vector<8x64xf32>
    %8 = arith.mulf %6, %7 : vector<8x64xf32>
    %9 = arith.truncf %8 : vector<8x64xf32> to vector<8x64xbf16>
    %c0_7 = arith.constant 0 : index
    %c0_8 = arith.constant 0 : index
    %c0_9 = arith.constant 0 : index
    %10 = vector.load %arg5[%c0_7, %c0_8, %c0_9] : memref<1x8x64xbf16, #tpu.memory_space<vmem>>, vector<1x8x64xbf16>
    %11 = vector.shape_cast %10 : vector<1x8x64xbf16> to vector<8x64xbf16>
    %12 = vector.shape_cast %9 : vector<8x64xbf16> to vector<1x8x64xbf16>
    tpu.vector_store %arg5[%c0_7, %c0_8, %c0_9], %12 {strides = array<i32>} : memref<1x8x64xbf16, #tpu.memory_space<vmem>>, vector<1x8x64xbf16>,
    return
  }
  func.func @transform_0(%arg0: i32, %arg1: i32) -> (i32, i32, i32) {
    %c0_i32 = arith.constant 0 : i32
    %c0_i32_0 = arith.constant 0 : i32
    return %arg0, %arg1, %c0_i32 : i32, i32, i32
  }
  func.func @transform_1(%arg0: i32, %arg1: i32) -> (i32, i32) {
    %c0_i32 = arith.constant 0 : i32
    %c0_i32_0 = arith.constant 0 : i32
    %c0_i32_1 = arith.constant 0 : i32
    return %c0_i32, %c0_i32_0 : i32, i32
  }
  func.func @transform_2(%arg0: i32, %arg1: i32) -> (i32, i32) {
    %c0_i32 = arith.constant 0 : i32
    %c0_i32_0 = arith.constant 0 : i32
    %c0_i32_1 = arith.constant 0 : i32
    return %c0_i32, %c0_i32_0 : i32, i32
  }
  func.func @transform_3(%arg0: i32, %arg1: i32) -> (i32, i32, i32) {
    %c0_i32 = arith.constant 0 : i32
    %c0_i32_0 = arith.constant 0 : i32
    return %arg0, %arg1, %c0_i32 : i32, i32, i32
  }
}

</mosaic_0001>

<bundles_post_ra>
// kernel: tpu_custom_call.1
= control target key start
LH: loop header
LB: loop body
LE: loop exit
PB: predicated region body
PF: predicated region fallthrough
CT: control target
= control target key end

     0   :  { %8 = vsyncpa [#allocation3], 0  ;;  %s791_s0 = inlined_call_operand.hbm [shape: bf16[2,8,32], index: 0, kind: input, shape index: {}]   ;;  %s792_s1 = inlined_call_operand.hbm [shape: bf16[32,64], index: 1, kind: input, shape index: {}]   ;;  %s793_s2 = inlined_call_operand.vmem [shape: f32[1,64], index: 2, kind: input, shape index: {}]   ;;  %s794_s3 = inlined_call_operand.hbm [shape: bf16[2,8,64], index: 3, kind: output, shape index: {}]  }
   0x1   :  { %10 = vsyncpa [#allocation3 + $0x1], 0 }
   0x2   :  { %11 = vsyncpa [#allocation6], 0 }
   0x3   :  { %12 = vsyncpa [#allocation4], 0 }
   0x4   :  { %14 = vsyncpa [#allocation4 + $0x1], 0  ;;  %s645_s12 = smov 0   ;;  %s647_s13 = smov 0  }
   0x5   :  { %s649_s14 = smov 0   ;;  %s651_s15 = smov 0  }
   0x6   :  { %s653_s16 = smov 0   ;;  %s655_s17 = smov 0  }
   0x7 LB: > { %s372_s18 = sadd.s32 4294967295, %s620_s17   ;;  %p374_p0 = scmp.ge.s32.totalorder %s620_s17, 1  ;;  %s620_s17 = sphi %s655_s17, %s20_s17   ;;  %s616_s16 = sphi %s653_s16, %s805_s16   ;;  %s612_s15 = sphi %s651_s15, %s804_s15   ;;  %s608_s14 = sphi %s649_s14, %s803_s14   ;;  %s604_s13 = sphi %s647_s13, %s802_s13   ;;  %s600_s12 = sphi %s645_s12, %s801_s12  }
   0x8   : > { %p677_p1 = scmp.eq.s32.totalorder %s372_s18, 0  ;;  %p135_p2 = scmp.lt.s32.totalorder %s620_s17, 3 }
   0x9   : > { %s146_s22 = sshll.u32 %s792_s1, 4  ;;  %s622_s24 = smov [#allocation5]   ;;  %s147_s22 = int_to_ptr.hbm [resolvable:$true] %s146_s22 }
   0xa   : > { %p685_p3 = pnand %p374_p0, %p135_p2  ;;  %s148_s25 = sshll.u32 %s622_s24, 4  ;;  %s149_s25 = int_to_ptr.vmem [resolvable:$true] %s148_s25 }
   0xb   : > { %p376_p6 = scmp.ge.s32.totalorder %s620_s17, 2  ;;  %s623_s26 = smov 64  }
   0xc   : > { %p406_p4 = pneg %p685_p3  ;;  %s624_s27 = smov 4  }
   0xd   : > { %s373_s28 = sadd.s32 4294967294, %s620_s17   ;;  %s32_s29 = sadd.s32 1, %s616_s16 }
   0xe   : > { %p407_p5 = pnand %p406_p4, %p677_p1  ;;  %s41_s30 = sadd.s32 1, %s608_s14 }
   0xf   : > { %p34_p7 = scmp.ge.s32.totalorder %s32_s29, 2  ;;  %p48_p8 = scmp.ne.s32.totalorder %s608_s14, %s604_s13 }
  0x10   : > { %409 = dma.hbm_to_vmem [thread:$0]  (!%p407_p5), %s147_s22, 256, %s149_s25, [#allocation6], %s623_s26, %s623_s26, %s624_s27  }
  0x11   : > { %p49_p9 = scmp.eq.s32.totalorder %s620_s17, 0  ;;  %p54_p10 = scmp.ne.s32.totalorder %s604_s13, %s600_s12 }
  0x12   : > { %s807_s29 = smov (%p34_p7, %s32_s29), 0  ;;  %p122_p13 = scmp.eq.s32.totalorder %s372_s18, 1 }
  0x13   : > { %p704_p11 = por %p49_p9, %p48_p8  ;;  %p710_p12 = por %p677_p1, %p54_p10 }
  0x14   : > { %s36_s6 = ssub.s32 %s616_s16, %s807_s29  ;;  %p128_p2 = scmp.eq.s32.totalorder %s373_s28, 1 }
  0x15   : > { %p39_p0 = scmp.eq.s32.totalorder %s36_s6, 0  ;;  %p716_p4 = por %p122_p13, %p48_p8 }
  0x16   : > { %p419_p5 = scmp.lt.s32.totalorder %s620_s17, 2  ;;  %p724_p7 = por %p128_p2, %p54_p10 }
  0x17   : > { %s722_s8 = scalar_select %p39_p0, %s608_s14, %s41_s30  }
  0x18   : > { %s165_s10 = sand.u32 1, %s608_s14   ;;  %s378_s20 = sshll.u32 %s616_s16, 2 }
  0x19   : > { %s377_s11 = sshll.u32 %s165_s10, 2  ;;  %s174_s18 = scalar_lea.hbm %s791_s0, %s378_s20 }
  0x1a   : > { %s169_s24 = scalar_lea.vmem [#allocation2], %s377_s11  ;;  %s176_s26 = sshll.u32 %s174_s18, 4  ;;  %s177_s26 = int_to_ptr.hbm [resolvable:$true] %s176_s26 }
  0x1b   : > { %s178_s25 = sshll.u32 %s169_s24, 4  ;;  %p411_p8 = pnand %p419_p5, %p704_p11  ;;  %s179_s25 = int_to_ptr.vmem [resolvable:$true] %s178_s25 }
  0x1c   : > { %s166_s27 = scalar_lea.sflag [#allocation3], %s165_s10  ;;  %187 = sbr.rel (%p685_p3) target bundleno = 180 (0xb4), region = 32 }
  0x1d   : > { %413 = dma.hbm_to_vmem [thread:$0]  (!%p411_p8), %s177_s26, 64, %s179_s25, %s166_s27  }
  0x1e   : > { %s738_s28 = sand.u32 (!%p685_p3), 1, %s604_s13  }
  0x1f   : > { %s380_s30 = sshll.u32 (!%p685_p3), %s738_s28, 2  ;;  %s190_s6 = scalar_lea.sflag (!%p685_p3), [#allocation3], %s738_s28 }
  0x20   : > { %s193_s11 = scalar_lea.vmem (!%p685_p3), [#allocation2], %s380_s30 }
  0x21   : > { %587 = dma.done.wait (%p710_p12), %s190_s6, 64  }
  0x22   : > { %589 = vsyncadd (%p710_p12), %s190_s6, 4294967232 }
  0x23   : > { %591 = dma.done.wait (%p677_p1), [#allocation6], 256  }
  0x24   : > { %593 = vsyncadd (%p677_p1), [#allocation6], 4294967040  ;;  %v397_v0 = vld [vmem:[#allocation5 + $0x8] sm:$0xff]  ;;  %v396_v1 = vld [vmem:[#allocation5] sm:$0xff]  ;;  %vm244_vm0 = vcmask 261120   ;;  %s393_s23 = sshll.u32 %s612_s15, 2 }
  0x25   : > { %254 = vmatpush.bf16.msra.mxu0 %v397_v0  ;;  %v223_v2 = vld [vmem:[%s193_s11] sm:$0xf]  ;;  %s277_s21 = scalar_lea.hbm %s794_s3, %s393_s23  ;;  %s221_s19 = scalar_lea.vmem [#allocation7], %s380_s30  ;;  %vm263_vm1 = vcmask 519168  }
  0x26   : > { %v473_v3 = vld [vmem:[%s793_s2] ss:$0 sm:$0xff]  ;;  %s279_s22 = sshll.u32 %s221_s19, 4  ;;  %s281_s18 = sshll.u32 %s277_s21, 4  ;;  %s280_s22 = int_to_ptr.vmem [resolvable:$true] %s279_s22  ;;  %s282_s18 = int_to_ptr.hbm [resolvable:$true] %s281_s18 }
  0x27   : > { %s266_s15 = scalar_lea.sflag [#allocation4], %s738_s28  ;;  %s548_s24 = sshra.s32 %s282_s18, 4  ;;  %s549_s24 = int_to_ptr.hbm [resolvable:$true] %s548_s24 }
  0x28   : > { %s550_s25 = scalar_lea.hbm %s549_s24, 4  ;;  %s554_s30 = scalar_lea.hbm %s794_s3, 8 }
  0x29   : > { %255 = vmatpush.bf16.msra.mxu0 %v396_v1  ;;  %p551_p1 = scmp.ne.s32.totalorder %s549_s24, %s550_s25  ;;  %p555_p10 = scmp.lt.s32.totalorder %s549_s24, %s794_s3 }
  0x2a   : > { %p556_p11 = scmp.lt.s32.totalorder %s554_s30, %s550_s25 }
  0x2b   : > { %p552_p3 = pnand %p551_p1, %p716_p4 }
  0x2c   : > { %391 = vmatmul.msk.bf16.vlgmr.msra.gmra.mxu0 %vm244_vm0, %v223_v2  ;;  %p557_p12 = por %p556_p11, %p555_p10 }
  0x2d   : > { %p553_p9 = pneg %p552_p3 }
  0x2f   : > { %p558_p13 = pnand %p557_p12, %p553_p9 }
  0xa9   : > { %v257_v4 = vpop.f32.mrf.mxu0 }
  0xaa   : > { %v258_v5 = vadd.f32 %v473_v3, %v257_v4 }
  0xac   : > { %v261_v6 = vmul.f32 0.25, %v258_v5 }
  0xae   : > { %v262_v7 = vpack.c.bf16 %v261_v6, %v261_v6 }
  0xb0   : > { %264 = vst.msk [vmem:[%s221_s19] sm:$0xf] %vm263_vm1, %v262_v7 }
  0xb1   : > { %v259_v8 = vpop.f32.mrf.mxu0 }
  0xb2   : > { %561 = shalt.err (!%p558_p13)
}
  0xb3   : > { %404 = dma.vmem_to_hbm [thread:$0]  (%p716_p4), %s280_s22, 64, %s282_s18, %s266_s15  }
  0xb4 PF: > { %s293_s28 = sand.u32 1, %s600_s12   ;;  %p415_p0 = pnand %p376_p6, %p724_p7 }
  0xb5   : > { %s294_s23 = scalar_lea.sflag [#allocation4], %s293_s28 }
  0xb6   : > { %p416_p2 = pneg %p415_p0 }
  0xb8   : > { %595 = dma.done.wait (%p416_p2), %s294_s23, 64  }
  0xb9   : > { %597 = vsyncadd (%p416_p2), %s294_s23, 4294967232  ;;  %s20_s17 = sadd.s32 1, %s620_s17   ;;  %s801_s12 = smov %s604_s13 }
  0xba   : > { %p17_p5 = scmp.ge.s32.totalorder %s20_s17, 4   ;;  %s802_s13 = smov %s608_s14 }
  0xbb   : > { %s803_s14 = smov %s722_s8  ;;  %s804_s15 = smov %s616_s16 }
  0xbc   : > { %s805_s16 = smov %s807_s29  ;;  %19 = sbr.rel (!%p17_p5) target bundleno = 7 (0x7), region = 81 }
  0xc1   :  { %300 = vsyncpa [#allocation3], 1 }
  0xc2   :  { %302 = vsyncpa [#allocation3 + $0x1], 1 }
  0xc3   :  { %303 = vsyncpa [#allocation6], 1 }
  0xc4   :  { %304 = vsyncpa [#allocation4], 1 }
  0xc5   :  { %306 = vsyncpa [#allocation4 + $0x1], 1 }

</bundles_post_ra>
